<compile_context>
chip_gen: v7x
topology: tpu7x:2x2x1
jax: 0.10.0
libtpu: 0.0.40
codegen_flags: <defaults>
</compile_context>

<pallas_src>
import functools

import jax
import jax.numpy as jnp
from jax.experimental import pallas as pl
from jax.experimental.pallas import tpu as pltpu


# --------------------------------------------------------------------------- #
# Helpers
# --------------------------------------------------------------------------- #
def _layernorm(x, alpha, bias, eps):
    # torch Norm: alpha * (x - mean) / (std_unbiased + eps) + bias
    d = x.shape[-1]
    mean = jnp.sum(x, axis=-1, keepdims=True) * (1.0 / d)
    diff = x - mean
    var = jnp.sum(diff * diff, axis=-1, keepdims=True) * (1.0 / (d - 1))
    inv = pl.reciprocal(jnp.sqrt(var) + eps, approx=False)     # EUP, not VPU divide
    return alpha * (diff * inv) + bias


_BUFFERED_OK = None


def _probe_buffered_single():
    """True iff pipeline_mode=pl.Buffered(1) is accepted by this JAX/Mosaic."""
    if not hasattr(pl, "Buffered"):
        return False

    def _copy(x_ref, o_ref):
        o_ref[...] = x_ref[...]

    try:
        spec = pl.BlockSpec((8, 128), lambda i: (0, 0),
                            pipeline_mode=pl.Buffered(1))
        fn = pl.pallas_call(
            _copy,
            out_shape=jax.ShapeDtypeStruct((8, 128), jnp.float32),
            grid=(1,),
            in_specs=[spec],
            out_specs=pl.BlockSpec((8, 128), lambda i: (0, 0)),
        )
        jax.block_until_ready(fn(jnp.zeros((8, 128), jnp.float32)))
        return True
    except Exception:
        return False


def _buffered_single_ok():
    global _BUFFERED_OK
    if _BUFFERED_OK is None:
        _BUFFERED_OK = _probe_buffered_single()
    return _BUFFERED_OK


def _const_spec(shape, grid_rank):
    """Whole-array block, replicated across the grid (constant block index)."""
    if grid_rank == 2:
        idx = lambda b, i: (0,) * len(shape)
    else:
        idx = lambda b, i, j: (0,) * len(shape)
    if _buffered_single_ok():
        # single-buffered: block index never changes, double buffering is waste
        return pl.BlockSpec(shape, idx, pipeline_mode=pl.Buffered(1))
    return pl.BlockSpec(shape, idx)


# --------------------------------------------------------------------------- #
# Kernel 1: norm_1 + Q/K/V projection  -> (B, H, S, d_k) bf16, Q pre-scaled
# --------------------------------------------------------------------------- #
def qkv_project_kernel(x_ref, a1_ref, g1_ref,
                       wq_ref, bq_ref, wk_ref, bk_ref, wv_ref, bv_ref,
                       q_ref, k_ref, v_ref, *, heads, d_k, eps):
    x = x_ref[0]                                              # (TS, D) fp32
    x2 = _layernorm(x, a1_ref[...], g1_ref[...], eps).astype(jnp.bfloat16)
    scale = 1.0 / (float(d_k) ** 0.5)

    q = jnp.dot(x2, wq_ref[...], preferred_element_type=jnp.float32) + bq_ref[...]
    k = jnp.dot(x2, wk_ref[...], preferred_element_type=jnp.float32) + bk_ref[...]
    v = jnp.dot(x2, wv_ref[...], preferred_element_type=jnp.float32) + bv_ref[...]

    ts = x.shape[0]

    def to_heads(t):                                          # (TS, D) -> (H, TS, d_k)
        return jnp.swapaxes(t.reshape(ts, heads, d_k), 0, 1).astype(jnp.bfloat16)

    q_ref[0] = to_heads(q * scale)                            # fold softmax scale
    k_ref[0] = to_heads(k)
    v_ref[0] = to_heads(v)


# --------------------------------------------------------------------------- #
# Kernel 2: flash attention over precomputed head-major Q/K/V
# --------------------------------------------------------------------------- #
def flash_attn_kernel(q_ref, k_ref, v_ref, mask_ref, c_ref,
                      m_scr, l_scr, acc_scr, *, heads, d_k):
    j = pl.program_id(2)                                      # kv-tile ("arbitrary")
    nj = pl.num_programs(2)

    @pl.when(j == 0)
    def _init():
        m_scr[...] = jnp.full_like(m_scr, -jnp.inf)
        l_scr[...] = jnp.zeros_like(l_scr)
        acc_scr[...] = jnp.zeros_like(acc_scr)

    # additive mask bias, computed once per kv tile (hoisted out of heads/queries)
    neg = jnp.where(mask_ref[0] == 0.0, jnp.float32(-1e9), jnp.float32(0.0))  # (1, TK)

    # batched-over-heads scores: (H, TQ, d_k) x (H, TK, d_k) -> (H, TQ, TK)
    s = jnp.einsum('hqd,hkd->hqk', q_ref[0], k_ref[0],
                   preferred_element_type=jnp.float32)
    s = s + neg

    # online (flash) softmax update
    m_prev = m_scr[...]
    m_new = jnp.maximum(m_prev, jnp.max(s, axis=-1, keepdims=True))
    corr = jnp.exp(m_prev - m_new)
    p = jnp.exp(s - m_new)                                    # unnormalized probs
    l_scr[...] = corr * l_scr[...] + jnp.sum(p, axis=-1, keepdims=True)
    acc_scr[...] = corr * acc_scr[...] + jnp.einsum(
        'hqk,hkd->hqd', p.astype(jnp.bfloat16), v_ref[0],
        preferred_element_type=jnp.float32)
    m_scr[...] = m_new

    @pl.when(j == nj - 1)
    def _finalize():
        inv_l = pl.reciprocal(l_scr[...], approx=True)        # (H, TQ, 1), EUP
        attn = acc_scr[...] * inv_l                           # (H, TQ, d_k)
        tq = attn.shape[1]
        c_ref[0] = jnp.swapaxes(attn, 0, 1).reshape(
            tq, heads * d_k).astype(jnp.bfloat16)


# --------------------------------------------------------------------------- #
# Kernel 3: output projection + residual + norm_2 + FFN (d_ff streamed) + residual
# --------------------------------------------------------------------------- #
def out_ffn_kernel(x_ref, c_ref, wo_ref, bo_ref, a2_ref, g2_ref,
                   w1_ref, b1_ref, w2_ref, b2_ref, o_ref,
                   xres_scr, x2_scr, acc_scr, *, eps):
    f = pl.program_id(2)                                      # d_ff tile ("arbitrary")
    nf = pl.num_programs(2)

    @pl.when(f == 0)
    def _init():
        attn_out = jnp.dot(c_ref[0], wo_ref[...],
                           preferred_element_type=jnp.float32) + bo_ref[...]
        xres = x_ref[0] + attn_out                            # dropout_1 = identity
        xres_scr[...] = xres
        x2_scr[...] = _layernorm(
            xres, a2_ref[...], g2_ref[...], eps).astype(jnp.bfloat16)
        acc_scr[...] = jnp.zeros_like(acc_scr)

    # ReLU decomposes exactly over hidden-dim tiles: relu(x2 @ w1_f + b1_f) @ w2_f
    h = jnp.maximum(
        jnp.dot(x2_scr[...], w1_ref[...], preferred_element_type=jnp.float32)
        + b1_ref[...], 0.0)
    acc_scr[...] += jnp.dot(h.astype(jnp.bfloat16), w2_ref[...],
                            preferred_element_type=jnp.float32)

    @pl.when(f == nf - 1)
    def _finalize():
        o_ref[0] = xres_scr[...] + acc_scr[...] + b2_ref[...]  # dropout_2 = identity


# --------------------------------------------------------------------------- #
# Wrapper
# --------------------------------------------------------------------------- #
def encoder_layer(x, mask, params, heads, eps=1e-6, tq=None, tk=None, tf=None):
    B, S, D = x.shape
    assert D % heads == 0
    d_k = D // heads
    d_ff = params["w1"].shape[1]

    # tile sizes (must divide the respective full extents)
    # v7x: prefer tk<=256 and tq such that B*n_q >= 2; v5e/v6e: larger tq is fine.
    if tq is None:
        tq = min(S, 256)
    if tk is None:
        tk = min(S, 256)
    if tf is None:
        tf = min(d_ff, 2048)
    assert S % tq == 0 and S % tk == 0 and d_ff % tf == 0
    n_q, n_kv, n_ff = S // tq, S // tk, d_ff // tf

    def wb(name):  # bf16 weights for the MXU (fp32 accumulation in-kernel)
        return params[name].astype(jnp.bfloat16)

    def cparams(sem):
        # 48 MiB: within v7x's 64 MiB physical VMEM with headroom, above the
        # 16/32 MiB scoped defaults elsewhere; raise toward ~96 MiB on v5e/v6e.
        return pltpu.CompilerParams(dimension_semantics=sem,
                                    vmem_limit_bytes=48 * 1024 * 1024)

    # ---- Kernel 1: Q/K/V precompute (head-major bf16 in HBM) -----------------
    head_shape = jax.ShapeDtypeStruct((B, heads, S, d_k), jnp.bfloat16)
    head_spec = pl.BlockSpec((1, heads, tq, d_k), lambda b, i: (b, 0, i, 0))
    q_h, k_h, v_h = pl.pallas_call(
        functools.partial(qkv_project_kernel, heads=heads, d_k=d_k, eps=eps),
        out_shape=(head_shape, head_shape, head_shape),
        grid_spec=pltpu.PrefetchScalarGridSpec(
            num_scalar_prefetch=0,
            grid=(B, S // tq),
            in_specs=[
                pl.BlockSpec((1, tq, D), lambda b, i: (b, i, 0)),   # x tile
                _const_spec((1, D), 2), _const_spec((1, D), 2),     # norm_1
                _const_spec((D, D), 2), _const_spec((1, D), 2),     # q_linear
                _const_spec((D, D), 2), _const_spec((1, D), 2),     # k_linear
                _const_spec((D, D), 2), _const_spec((1, D), 2),     # v_linear
            ],
            out_specs=[head_spec, head_spec, head_spec]),
        compiler_params=cparams(("parallel", "parallel")),
    )(x, params["a1"], params["g1"],
      wb("wq"), params["bq"], wb("wk"), params["bk"], wb("wv"), params["bv"])

    # ---- Kernel 2: flash attention -> bf16 concat (pre output projection) ----
    concat = pl.pallas_call(
        functools.partial(flash_attn_kernel, heads=heads, d_k=d_k),
        out_shape=jax.ShapeDtypeStruct((B, S, D), jnp.bfloat16),
        grid_spec=pltpu.PrefetchScalarGridSpec(
            num_scalar_prefetch=0,
            grid=(B, n_q, n_kv),
            in_specs=[
                pl.BlockSpec((1, heads, tq, d_k), lambda b, i, j: (b, 0, i, 0)),
                pl.BlockSpec((1, heads, tk, d_k), lambda b, i, j: (b, 0, j, 0)),
                pl.BlockSpec((1, heads, tk, d_k), lambda b, i, j: (b, 0, j, 0)),
                pl.BlockSpec((1, 1, tk), lambda b, i, j: (b, 0, j)),   # key mask
            ],
            out_specs=pl.BlockSpec((1, tq, D), lambda b, i, j: (b, i, 0)),
            scratch_shapes=[
                pltpu.VMEM((heads, tq, 1), jnp.float32),   # running max
                pltpu.VMEM((heads, tq, 1), jnp.float32),   # running denominator
                pltpu.VMEM((heads, tq, d_k), jnp.float32), # unnormalized acc
            ]),
        compiler_params=cparams(("parallel", "parallel", "arbitrary")),
    )(q_h, k_h, v_h, mask)

    # ---- Kernel 3: out-proj + residual + norm_2 + FFN (d_ff streamed) --------
    out = pl.pallas_call(
        functools.partial(out_ffn_kernel, eps=eps),
        out_shape=jax.ShapeDtypeStruct((B, S, D), jnp.float32),
        grid_spec=pltpu.PrefetchScalarGridSpec(
            num_scalar_prefetch=0,
            grid=(B, n_q, n_ff),
            in_specs=[
                pl.BlockSpec((1, tq, D), lambda b, i, f: (b, i, 0)),   # x (residual)
                pl.BlockSpec((1, tq, D), lambda b, i, f: (b, i, 0)),   # attn concat
                _const_spec((D, D), 3), _const_spec((1, D), 3),        # out linear
                _const_spec((1, D), 3), _const_spec((1, D), 3),        # norm_2
                pl.BlockSpec((D, tf), lambda b, i, f: (0, f)),         # ff w1 chunk
                pl.BlockSpec((1, tf), lambda b, i, f: (0, f)),         # ff b1 chunk
                pl.BlockSpec((tf, D), lambda b, i, f: (f, 0)),         # ff w2 chunk
                _const_spec((1, D), 3),                                # ff b2
            ],
            out_specs=pl.BlockSpec((1, tq, D), lambda b, i, f: (b, i, 0)),
            scratch_shapes=[
                pltpu.VMEM((tq, D), jnp.float32),    # xres (post-attention residual)
                pltpu.VMEM((tq, D), jnp.bfloat16),   # norm_2 output (FFN input)
                pltpu.VMEM((tq, D), jnp.float32),    # FFN accumulator
            ]),
        compiler_params=cparams(("parallel", "parallel", "arbitrary")),
    )(x, concat,
      wb("wo"), params["bo"], params["a2"], params["g2"],
      wb("w1"), params["b1"], wb("w2"), params["b2"])

    return out


# --------------------------------------------------------------------------- #
# Pure-JAX fp32 reference mirroring the PyTorch module (eval mode)
# --------------------------------------------------------------------------- #
def ref_encoder_layer(x, mask, p, heads, eps=1e-6):
    B, S, D = x.shape
    d_k = D // heads

    def norm(x, a, b):
        m = jnp.mean(x, axis=-1, keepdims=True)
        s = jnp.std(x, axis=-1, keepdims=True, ddof=1)
        return a * (x - m) / (s + eps) + b

    x2 = norm(x, p["a1"], p["g1"])
    q = (x2 @ p["wq"] + p["bq"]).reshape(B, S, heads, d_k).transpose(0, 2, 1, 3)
    k = (x2 @ p["wk"] + p["bk"]).reshape(B, S, heads, d_k).transpose(0, 2, 1, 3)
    v = (x2 @ p["wv"] + p["bv"]).reshape(B, S, heads, d_k).transpose(0, 2, 1, 3)
    scores = jnp.einsum("bhqd,bhkd->bhqk", q, k) / jnp.sqrt(jnp.float32(d_k))
    scores = jnp.where(mask[:, None, :, :] == 0, -1e9, scores)
    probs = jax.nn.softmax(scores, axis=-1)
    attn = jnp.einsum("bhqk,bhkd->bhqd", probs, v)
    concat = attn.transpose(0, 2, 1, 3).reshape(B, S, D)
    x = x + (concat @ p["wo"] + p["bo"])

    x2 = norm(x, p["a2"], p["g2"])
    ff = jnp.maximum(x2 @ p["w1"] + p["b1"], 0.0) @ p["w2"] + p["b2"]
    return x + ff


def init_params(key, d_model, d_ff):
    ks = jax.random.split(key, 8)
    sc = 0.05
    return {
        "a1": jnp.ones((1, d_model), jnp.float32),
        "g1": jnp.zeros((1, d_model), jnp.float32),
        "wq": sc * jax.random.normal(ks[0], (d_model, d_model), jnp.float32),
        "bq": sc * jax.random.normal(ks[1], (1, d_model), jnp.float32),
        "wk": sc * jax.random.normal(ks[2], (d_model, d_model), jnp.float32),
        "bk": jnp.zeros((1, d_model), jnp.float32),
        "wv": sc * jax.random.normal(ks[3], (d_model, d_model), jnp.float32),
        "bv": jnp.zeros((1, d_model), jnp.float32),
        "wo": sc * jax.random.normal(ks[4], (d_model, d_model), jnp.float32),
        "bo": sc * jax.random.normal(ks[5], (1, d_model), jnp.float32),
        "a2": jnp.ones((1, d_model), jnp.float32),
        "g2": jnp.zeros((1, d_model), jnp.float32),
        "w1": sc * jax.random.normal(ks[6], (d_model, d_ff), jnp.float32),
        "b1": jnp.zeros((1, d_ff), jnp.float32),
        "w2": sc * jax.random.normal(ks[7], (d_ff, d_model), jnp.float32),
        "b2": jnp.zeros((1, d_model), jnp.float32),
    }


if __name__ == "__main__":
    B, S, D, H, D_FF = 2, 8, 32, 4, 64

    key = jax.random.PRNGKey(0)
    k_x, k_p = jax.random.split(key)
    x = jax.random.normal(k_x, (B, S, D), jnp.float32)
    # padding mask: last two key positions of batch 1 are masked out
    mask = jnp.ones((B, 1, S), jnp.float32).at[1, 0, -2:].set(0.0)
    params = init_params(k_p, D, D_FF)

    out = encoder_layer(x, mask, params, heads=H)
    out = jax.block_until_ready(out)

    ref = ref_encoder_layer(x, mask, params, heads=H)
    assert out.shape == (B, S, D)
    # bf16 matmul operands (fp32 accumulation) -> loosened tolerance vs fp32 ref.
    assert jnp.allclose(out, ref, atol=3e-2, rtol=3e-2), "mismatch vs JAX reference"

    print("KERNEL_OK")
</pallas_src>

<mosaic_0001>
module attributes {stable_mosaic.version = 11 : i64} {
  func.func @_copy(%arg0: i32, %arg1: memref<8x128xf32, #tpu.memory_space<vmem>>, %arg2: memref<8x128xf32, #tpu.memory_space<vmem>>) attributes {dimension_semantics = [#tpu.dimension_semantics<arbitrary>], iteration_bounds = array<i64: 1>, scalar_prefetch = 0 : i64, scratch_operands = 0 : i64, tpu.core_type = #tpu.core_type<tc>, window_params = [{pipeline_mode = #tpu.pipeline_mode<synchronous>, transform_indices = @transform_0, window_bounds = array<i64: 8, 128>}, {pipeline_mode = #tpu.pipeline_mode<synchronous>, transform_indices = @transform_1, window_bounds = array<i64: 8, 128>}]} {
    %c0 = arith.constant 0 : index
    %c0_0 = arith.constant 0 : index
    %0 = vector.load %arg1[%c0, %c0_0] : memref<8x128xf32, #tpu.memory_space<vmem>>, vector<8x128xf32>
    %c0_1 = arith.constant 0 : index
    %c0_2 = arith.constant 0 : index
    %1 = vector.load %arg2[%c0_1, %c0_2] : memref<8x128xf32, #tpu.memory_space<vmem>>, vector<8x128xf32>
    tpu.vector_store %arg2[%c0_1, %c0_2], %0 {strides = array<i32>} : memref<8x128xf32, #tpu.memory_space<vmem>>, vector<8x128xf32>,
    return
  }
  func.func @transform_0(%arg0: i32) -> (i32, i32) {
    %c0_i32 = arith.constant 0 : i32
    %c0_i32_0 = arith.constant 0 : i32
    %c0_i32_1 = arith.constant 0 : i32
    return %c0_i32, %c0_i32_0 : i32, i32
  }
  func.func @transform_1(%arg0: i32) -> (i32, i32) {
    %c0_i32 = arith.constant 0 : i32
    %c0_i32_0 = arith.constant 0 : i32
    %c0_i32_1 = arith.constant 0 : i32
    return %c0_i32, %c0_i32_0 : i32, i32
  }
}

module attributes {stable_mosaic.version = 11 : i64} {
  func.func @qkv_project_kernel(%arg0: i32, %arg1: i32, %arg2: memref<1x8x32xf32, #tpu.memory_space<vmem>>, %arg3: memref<1x32xf32, #tpu.memory_space<vmem>>, %arg4: memref<1x32xf32, #tpu.memory_space<vmem>>, %arg5: memref<32x32xbf16, #tpu.memory_space<vmem>>, %arg6: memref<1x32xf32, #tpu.memory_space<vmem>>, %arg7: memref<32x32xbf16, #tpu.memory_space<vmem>>, %arg8: memref<1x32xf32, #tpu.memory_space<vmem>>, %arg9: memref<32x32xbf16, #tpu.memory_space<vmem>>, %arg10: memref<1x32xf32, #tpu.memory_space<vmem>>, %arg11: memref<1x4x8x8xbf16, #tpu.memory_space<vmem>>, %arg12: memref<1x4x8x8xbf16, #tpu.memory_space<vmem>>, %arg13: memref<1x4x8x8xbf16, #tpu.memory_space<vmem>>) attributes {dimension_semantics = [#tpu.dimension_semantics<parallel>, #tpu.dimension_semantics<parallel>], iteration_bounds = array<i64: 2, 1>, scalar_prefetch = 0 : i64, scratch_operands = 0 : i64, tpu.core_type = #tpu.core_type<tc>, window_params = [{transform_indices = @transform_0, window_bounds = array<i64: 1, 8, 32>}, {pipeline_mode = #tpu.pipeline_mode<synchronous>, transform_indices = @transform_1, window_bounds = array<i64: 1, 32>}, {pipeline_mode = #tpu.pipeline_mode<synchronous>, transform_indices = @transform_2, window_bounds = array<i64: 1, 32>}, {pipeline_mode = #tpu.pipeline_mode<synchronous>, transform_indices = @transform_3, window_bounds = array<i64: 32, 32>}, {pipeline_mode = #tpu.pipeline_mode<synchronous>, transform_indices = @transform_4, window_bounds = array<i64: 1, 32>}, {pipeline_mode = #tpu.pipeline_mode<synchronous>, transform_indices = @transform_5, window_bounds = array<i64: 32, 32>}, {pipeline_mode = #tpu.pipeline_mode<synchronous>, transform_indices = @transform_6, window_bounds = array<i64: 1, 32>}, {pipeline_mode = #tpu.pipeline_mode<synchronous>, transform_indices = @transform_7, window_bounds = array<i64: 32, 32>}, {pipeline_mode = #tpu.pipeline_mode<synchronous>, transform_indices = @transform_8, window_bounds = array<i64: 1, 32>}, {transform_indices = @transform_9, window_bounds = array<i64: 1, 4, 8, 8>}, {transform_indices = @transform_10, window_bounds = array<i64: 1, 4, 8, 8>}, {transform_indices = @transform_11, window_bounds = array<i64: 1, 4, 8, 8>}]} {
    %c0 = arith.constant 0 : index
    %c0_0 = arith.constant 0 : index
    %c0_1 = arith.constant 0 : index
    %0 = vector.load %arg2[%c0, %c0_0, %c0_1] : memref<1x8x32xf32, #tpu.memory_space<vmem>>, vector<1x8x32xf32>
    %1 = vector.shape_cast %0 : vector<1x8x32xf32> to vector<8x32xf32>
    %c0_2 = arith.constant 0 : index
    %c0_3 = arith.constant 0 : index
    %2 = vector.load %arg3[%c0_2, %c0_3] : memref<1x32xf32, #tpu.memory_space<vmem>>, vector<1x32xf32>
    %c0_4 = arith.constant 0 : index
    %c0_5 = arith.constant 0 : index
    %3 = vector.load %arg4[%c0_4, %c0_5] : memref<1x32xf32, #tpu.memory_space<vmem>>, vector<1x32xf32>
    %cst = arith.constant dense<0.000000e+00> : vector<8xf32>
    %4 = vector.multi_reduction <add>, %1, %cst [1] : vector<8x32xf32> to vector<8xf32>
    %5 = vector.shape_cast %4 : vector<8xf32> to vector<8x1xf32>
    %cst_6 = arith.constant 3.125000e-02 : f32
    %6 = vector.broadcast %cst_6 : f32 to vector<8x1xf32>
    %7 = arith.mulf %5, %6 : vector<8x1xf32>
    %8 = vector.broadcast %7 : vector<8x1xf32> to vector<8x32xf32>
    %9 = arith.subf %1, %8 : vector<8x32xf32>
    %10 = arith.mulf %9, %9 : vector<8x32xf32>
    %cst_7 = arith.constant dense<0.000000e+00> : vector<8xf32>
    %11 = vector.multi_reduction <add>, %10, %cst_7 [1] : vector<8x32xf32> to vector<8xf32>
    %12 = vector.shape_cast %11 : vector<8xf32> to vector<8x1xf32>
    %cst_8 = arith.constant 0.0322580636 : f32
    %13 = vector.broadcast %cst_8 : f32 to vector<8x1xf32>
    %14 = arith.mulf %12, %13 : vector<8x1xf32>
    %15 = math.sqrt %14 : vector<8x1xf32>
    %cst_9 = arith.constant 9.99999997E-7 : f32
    %16 = vector.broadcast %cst_9 : f32 to vector<8x1xf32>
    %17 = arith.addf %15, %16 : vector<8x1xf32>
    %18 = tpu.reciprocal %17 : vector<8x1xf32> -> vector<8x1xf32>
    %19 = vector.broadcast %18 : vector<8x1xf32> to vector<8x32xf32>
    %20 = arith.mulf %9, %19 : vector<8x32xf32>
    %21 = vector.broadcast %2 : vector<1x32xf32> to vector<8x32xf32>
    %22 = arith.mulf %21, %20 : vector<8x32xf32>
    %23 = vector.broadcast %3 : vector<1x32xf32> to vector<8x32xf32>
    %24 = arith.addf %22, %23 : vector<8x32xf32>
    %25 = arith.truncf %24 : vector<8x32xf32> to vector<8x32xbf16>
    %c0_10 = arith.constant 0 : index
    %c0_11 = arith.constant 0 : index
    %26 = vector.load %arg5[%c0_10, %c0_11] : memref<32x32xbf16, #tpu.memory_space<vmem>>, vector<32x32xbf16>
    %cst_12 = arith.constant dense<0.000000e+00> : vector<8x32xf32>
    %27 = tpu.matmul %25, %26, %cst_12 {dimension_numbers = #tpu.dot_dimension_numbers<[1], [0], [0], [1], [0, 0, 1, 1], [], []>} : vector<8x32xbf16>, vector<32x32xbf16>, vector<8x32xf32> -> vector<8x32xf32>
    %c0_13 = arith.constant 0 : index
    %c0_14 = arith.constant 0 : index
    %28 = vector.load %arg6[%c0_13, %c0_14] : memref<1x32xf32, #tpu.memory_space<vmem>>, vector<1x32xf32>
    %29 = vector.broadcast %28 : vector<1x32xf32> to vector<8x32xf32>
    %30 = arith.addf %27, %29 : vector<8x32xf32>
    %c0_15 = arith.constant 0 : index
    %c0_16 = arith.constant 0 : index
    %31 = vector.load %arg7[%c0_15, %c0_16] : memref<32x32xbf16, #tpu.memory_space<vmem>>, vector<32x32xbf16>
    %cst_17 = arith.constant dense<0.000000e+00> : vector<8x32xf32>
    %32 = tpu.matmul %25, %31, %cst_17 {dimension_numbers = #tpu.dot_dimension_numbers<[1], [0], [0], [1], [0, 0, 1, 1], [], []>} : vector<8x32xbf16>, vector<32x32xbf16>, vector<8x32xf32> -> vector<8x32xf32>
    %c0_18 = arith.constant 0 : index
    %c0_19 = arith.constant 0 : index
    %33 = vector.load %arg8[%c0_18, %c0_19] : memref<1x32xf32, #tpu.memory_space<vmem>>, vector<1x32xf32>
    %34 = vector.broadcast %33 : vector<1x32xf32> to vector<8x32xf32>
    %35 = arith.addf %32, %34 : vector<8x32xf32>
    %c0_20 = arith.constant 0 : index
    %c0_21 = arith.constant 0 : index
    %36 = vector.load %arg9[%c0_20, %c0_21] : memref<32x32xbf16, #tpu.memory_space<vmem>>, vector<32x32xbf16>
    %cst_22 = arith.constant dense<0.000000e+00> : vector<8x32xf32>
    %37 = tpu.matmul %25, %36, %cst_22 {dimension_numbers = #tpu.dot_dimension_numbers<[1], [0], [0], [1], [0, 0, 1, 1], [], []>} : vector<8x32xbf16>, vector<32x32xbf16>, vector<8x32xf32> -> vector<8x32xf32>
    %c0_23 = arith.constant 0 : index
    %c0_24 = arith.constant 0 : index
    %38 = vector.load %arg10[%c0_23, %c0_24] : memref<1x32xf32, #tpu.memory_space<vmem>>, vector<1x32xf32>
    %39 = vector.broadcast %38 : vector<1x32xf32> to vector<8x32xf32>
    %40 = arith.addf %37, %39 : vector<8x32xf32>
    %cst_25 = arith.constant 0.353553385 : f32
    %41 = vector.broadcast %cst_25 : f32 to vector<8x32xf32>
    %42 = arith.mulf %30, %41 : vector<8x32xf32>
    %43 = vector.shape_cast %42 : vector<8x32xf32> to vector<8x4x8xf32>
    %44 = tpu.transpose %43, [1, 0, 2] : vector<8x4x8xf32> -> vector<4x8x8xf32>
    %45 = arith.truncf %44 : vector<4x8x8xf32> to vector<4x8x8xbf16>
    %c0_26 = arith.constant 0 : index
    %c0_27 = arith.constant 0 : index
    %c0_28 = arith.constant 0 : index
    %c0_29 = arith.constant 0 : index
    %46 = vector.load %arg11[%c0_26, %c0_27, %c0_28, %c0_29] : memref<1x4x8x8xbf16, #tpu.memory_space<vmem>>, vector<1x4x8x8xbf16>
    %47 = vector.shape_cast %46 : vector<1x4x8x8xbf16> to vector<4x8x8xbf16>
    %48 = vector.shape_cast %45 : vector<4x8x8xbf16> to vector<1x4x8x8xbf16>
    tpu.vector_store %arg11[%c0_26, %c0_27, %c0_28, %c0_29], %48 {strides = array<i32>} : memref<1x4x8x8xbf16, #tpu.memory_space<vmem>>, vector<1x4x8x8xbf16>,
    %49 = vector.shape_cast %35 : vector<8x32xf32> to vector<8x4x8xf32>
    %50 = tpu.transpose %49, [1, 0, 2] : vector<8x4x8xf32> -> vector<4x8x8xf32>
    %51 = arith.truncf %50 : vector<4x8x8xf32> to vector<4x8x8xbf16>
    %c0_30 = arith.constant 0 : index
    %c0_31 = arith.constant 0 : index
    %c0_32 = arith.constant 0 : index
    %c0_33 = arith.constant 0 : index
    %52 = vector.load %arg12[%c0_30, %c0_31, %c0_32, %c0_33] : memref<1x4x8x8xbf16, #tpu.memory_space<vmem>>, vector<1x4x8x8xbf16>
    %53 = vector.shape_cast %52 : vector<1x4x8x8xbf16> to vector<4x8x8xbf16>
    %54 = vector.shape_cast %51 : vector<4x8x8xbf16> to vector<1x4x8x8xbf16>
    tpu.vector_store %arg12[%c0_30, %c0_31, %c0_32, %c0_33], %54 {strides = array<i32>} : memref<1x4x8x8xbf16, #tpu.memory_space<vmem>>, vector<1x4x8x8xbf16>,
    %55 = vector.shape_cast %40 : vector<8x32xf32> to vector<8x4x8xf32>
    %56 = tpu.transpose %55, [1, 0, 2] : vector<8x4x8xf32> -> vector<4x8x8xf32>
    %57 = arith.truncf %56 : vector<4x8x8xf32> to vector<4x8x8xbf16>
    %c0_34 = arith.constant 0 : index
    %c0_35 = arith.constant 0 : index
    %c0_36 = arith.constant 0 : index
    %c0_37 = arith.constant 0 : index
    %58 = vector.load %arg13[%c0_34, %c0_35, %c0_36, %c0_37] : memref<1x4x8x8xbf16, #tpu.memory_space<vmem>>, vector<1x4x8x8xbf16>
    %59 = vector.shape_cast %58 : vector<1x4x8x8xbf16> to vector<4x8x8xbf16>
    %60 = vector.shape_cast %57 : vector<4x8x8xbf16> to vector<1x4x8x8xbf16>
    tpu.vector_store %arg13[%c0_34, %c0_35, %c0_36, %c0_37], %60 {strides = array<i32>} : memref<1x4x8x8xbf16, #tpu.memory_space<vmem>>, vector<1x4x8x8xbf16>,
    return
  }
  func.func @transform_0(%arg0: i32, %arg1: i32) -> (i32, i32, i32) {
    %c0_i32 = arith.constant 0 : i32
    %c0_i32_0 = arith.constant 0 : i32
    return %arg0, %arg1, %c0_i32 : i32, i32, i32
  }
  func.func @transform_1(%arg0: i32, %arg1: i32) -> (i32, i32) {
    %c0_i32 = arith.constant 0 : i32
    %c0_i32_0 = arith.constant 0 : i32
    %c0_i32_1 = arith.constant 0 : i32
    return %c0_i32, %c0_i32_0 : i32, i32
  }
  func.func @transform_2(%arg0: i32, %arg1: i32) -> (i32, i32) {
    %c0_i32 = arith.constant 0 : i32
    %c0_i32_0 = arith.constant 0 : i32
    %c0_i32_1 = arith.constant 0 : i32
    return %c0_i32, %c0_i32_0 : i32, i32
  }
  func.func @transform_3(%arg0: i32, %arg1: i32) -> (i32, i32) {
    %c0_i32 = arith.constant 0 : i32
    %c0_i32_0 = arith.constant 0 : i32
    %c0_i32_1 = arith.constant 0 : i32
    return %c0_i32, %c0_i32_0 : i32, i32
  }
  func.func @transform_4(%arg0: i32, %arg1: i32) -> (i32, i32) {
    %c0_i32 = arith.constant 0 : i32
    %c0_i32_0 = arith.constant 0 : i32
    %c0_i32_1 = arith.constant 0 : i32
    return %c0_i32, %c0_i32_0 : i32, i32
  }
  func.func @transform_5(%arg0: i32, %arg1: i32) -> (i32, i32) {
    %c0_i32 = arith.constant 0 : i32
    %c0_i32_0 = arith.constant 0 : i32
    %c0_i32_1 = arith.constant 0 : i32
    return %c0_i32, %c0_i32_0 : i32, i32
  }
  func.func @transform_6(%arg0: i32, %arg1: i32) -> (i32, i32) {
    %c0_i32 = arith.constant 0 : i32
    %c0_i32_0 = arith.constant 0 : i32
    %c0_i32_1 = arith.constant 0 : i32
    return %c0_i32, %c0_i32_0 : i32, i32
  }
  func.func @transform_7(%arg0: i32, %arg1: i32) -> (i32, i32) {
    %c0_i32 = arith.constant 0 : i32
    %c0_i32_0 = arith.constant 0 : i32
    %c0_i32_1 = arith.constant 0 : i32
    return %c0_i32, %c0_i32_0 : i32, i32
  }
  func.func @transform_8(%arg0: i32, %arg1: i32) -> (i32, i32) {
    %c0_i32 = arith.constant 0 : i32
    %c0_i32_0 = arith.constant 0 : i32
    %c0_i32_1 = arith.constant 0 : i32
    return %c0_i32, %c0_i32_0 : i32, i32
  }
  func.func @transform_9(%arg0: i32, %arg1: i32) -> (i32, i32, i32, i32) {
    %c0_i32 = arith.constant 0 : i32
    %c0_i32_0 = arith.constant 0 : i32
    %c0_i32_1 = arith.constant 0 : i32
    return %arg0, %c0_i32, %arg1, %c0_i32_0 : i32, i32, i32, i32
  }
  func.func @transform_10(%arg0: i32, %arg1: i32) -> (i32, i32, i32, i32) {
    %c0_i32 = arith.constant 0 : i32
    %c0_i32_0 = arith.constant 0 : i32
    %c0_i32_1 = arith.constant 0 : i32
    return %arg0, %c0_i32, %arg1, %c0_i32_0 : i32, i32, i32, i32
  }
  func.func @transform_11(%arg0: i32, %arg1: i32) -> (i32, i32, i32, i32) {
    %c0_i32 = arith.constant 0 : i32
    %c0_i32_0 = arith.constant 0 : i32
    %c0_i32_1 = arith.constant 0 : i32
    return %arg0, %c0_i32, %arg1, %c0_i32_0 : i32, i32, i32, i32
  }
}

</mosaic_0001>

<bundles_post_ra>
// kernel: tpu_custom_call.1
= control target key start
LH: loop header
LB: loop body
LE: loop exit
PB: predicated region body
PF: predicated region fallthrough
CT: control target
= control target key end

     0   :  { %6 = vsyncpa [#allocation3], 0  ;;  %s124_s0 = inlined_call_operand.hbm [shape: f32[8,128], index: 0, kind: input, shape index: {}]   ;;  %s125_s1 = inlined_call_operand.hbm [shape: f32[8,128], index: 1, kind: output, shape index: {}]  }
   0x1   :  { %7 = vsyncpa [#allocation4], 0  ;;  %s88_s6 = smov [#allocation2]   ;;  %s40_s10 = scalar_lea.hbm %s124_s0, 128 }
   0x2   :  { %s14_s7 = sshll.u32 %s88_s6, 4  ;;  %p41_p0 = scmp.ne.s32.totalorder %s124_s0, %s40_s10  ;;  %s15_s7 = int_to_ptr.vmem [resolvable:$true] %s14_s7 }
   0x3   :  { %p44_p1 = scmp.lt.u32.totalorder %s40_s10, %s124_s0 }
   0x5   :  { %p46_p2 = pnand %p44_p1, %p41_p0 }
   0x7   :  { %49 = shalt.err (!%p46_p2)
}
   0x8   :  { %s50_s15 = scalar_lea.vmem %s15_s7, 128  ;;  %p55_p4 = scmp.lt.s32.totalorder %s15_s7, %s15_s7 }
   0x9   :  { %p51_p3 = scmp.ne.s32.totalorder %s15_s7, %s50_s15  ;;  %p56_p5 = scmp.lt.s32.totalorder %s50_s15, %s50_s15 }
   0xb   :  { %p57_p6 = por %p56_p5, %p55_p4 }
   0xd   :  { %p58_p7 = pnand %p57_p6, %p51_p3 }
   0xf   :  { %61 = shalt.err (!%p58_p7)
}
  0x10   :  { %17 = dma.hbm_to_vmem [thread:$0]  %s124_s0, 128, %s15_s7, [#allocation3]  }
  0x11   :  { %84 = dma.done.wait [#allocation3], 128  }
  0x12   :  { %85 = vsyncadd [#allocation3], 4294967168  ;;  %s89_s18 = smov [#allocation5]   ;;  %v21_v0 = vld [vmem:[#allocation2] sm:$0xff] }
  0x13   :  { %s29_s19 = sshll.u32 %s89_s18, 4  ;;  %22 = vst [vmem:[#allocation5] sm:$0xff] %v21_v0  ;;  %s30_s19 = int_to_ptr.vmem [resolvable:$true] %s29_s19 }
  0x14   :  { %s62_s20 = scalar_lea.vmem %s30_s19, 128  ;;  %p67_p9 = scmp.lt.s32.totalorder %s30_s19, %s30_s19 }
  0x15   :  { %p63_p8 = scmp.ne.s32.totalorder %s30_s19, %s62_s20  ;;  %p68_p10 = scmp.lt.s32.totalorder %s62_s20, %s62_s20 }
  0x17   :  { %p69_p11 = por %p68_p10, %p67_p9 }
  0x19   :  { %p70_p12 = pnand %p69_p11, %p63_p8 }
  0x1b   :  { %73 = shalt.err (!%p70_p12)
}
  0x1c   :  { %s74_s23 = scalar_lea.hbm %s125_s1, 128 }
  0x1d   :  { %p75_p13 = scmp.ne.s32.totalorder %s125_s1, %s74_s23  ;;  %p78_p0 = scmp.lt.u32.totalorder %s74_s23, %s125_s1 }
  0x1f   :  { %p80_p1 = pnand %p78_p0, %p75_p13 }
  0x21   :  { %83 = shalt.err (!%p80_p1)
}
  0x22   :  { %32 = dma.vmem_to_hbm [thread:$0]  %s30_s19, 128, %s125_s1, [#allocation4]  }
  0x23   :  { %86 = dma.done.wait [#allocation4], 128  }
  0x24   :  { %87 = vsyncadd [#allocation4], 4294967168 }
  0x25   :  { %36 = vsyncpa [#allocation3], 1 }
  0x26   :  { %37 = vsyncpa [#allocation4], 1 }

// kernel: tpu_custom_call.1
= control target key start
LH: loop header
LB: loop body
LE: loop exit
PB: predicated region body
PF: predicated region fallthrough
CT: control target
= control target key end

     0   :  { %s2443_s0 = inlined_call_operand.hbm [shape: f32[2,8,32], index: 0, kind: input, shape index: {}]   ;;  %s2444_s1 = inlined_call_operand.vmem [shape: f32[1,32], index: 1, kind: input, shape index: {}]   ;;  %s2445_s2 = inlined_call_operand.vmem [shape: f32[1,32], index: 2, kind: input, shape index: {}]   ;;  %s2446_s3 = inlined_call_operand.hbm [shape: bf16[32,32], index: 3, kind: input, shape index: {}]   ;;  %s2447_s4 = inlined_call_operand.hbm [shape: f32[1,32], index: 4, kind: input, shape index: {}]   ;;  %s2448_s5 = inlined_call_operand.vmem [shape: bf16[32,32], index: 5, kind: input, shape index: {}]   ;;  %s2449_s6 = inlined_call_operand.vmem [shape: f32[1,32], index: 6, kind: input, shape index: {}]   ;;  %s2450_s7 = inlined_call_operand.hbm [shape: bf16[32,32], index: 7, kind: input, shape index: {}]   ;;  %s2451_s8 = inlined_call_operand.vmem [shape: f32[1,32], index: 8, kind: input, shape index: {}]   ;;  %s2452_s9 = inlined_call_operand.hbm [shape: bf16[2,4,8,8], index: 9, kind: output, shape index: {0}]   ;;  %s2453_s10 = inlined_call_operand.hbm [shape: bf16[2,4,8,8], index: 10, kind: output, shape index: {1}]   ;;  %s2454_s11 = inlined_call_operand.hbm [shape: bf16[2,4,8,8], index: 11, kind: output, shape index: {2}]  }
   0x1   :  { %2468 = sst [smem:[#allocation22_spill]] %s2443_s0 }
   0x2   :  { %2469 = sst [smem:[#allocation23_spill]] %s2451_s8 }
   0x3   :  { %2470 = sst [smem:[#allocation24_spill]] %s2452_s9 }
   0x4   :  { %2471 = sst [smem:[#allocation25_spill]] %s2453_s10 }
   0x5   :  { %2472 = sst [smem:[#allocation26_spill]] %s2454_s11 }
   0x6   :  { %17 = vsyncpa [#allocation3], 0 }
   0x7   :  { %19 = vsyncpa [#allocation3 + $0x1], 0 }
   0x8   :  { %20 = vsyncpa [#allocation6], 0 }
   0x9   :  { %21 = vsyncpa [#allocation9], 0 }
   0xa   :  { %22 = vsyncpa [#allocation4], 0 }
   0xb   :  { %24 = vsyncpa [#allocation4 + $0x1], 0 }
   0xc   :  { %25 = vsyncpa [#allocation12], 0 }
   0xd   :  { %27 = vsyncpa [#allocation12 + $0x1], 0  ;;  %s1968_s17 = smov 0   ;;  %s1970_s18 = smov 0  }
   0xe   :  { %s1972_s19 = smov 0   ;;  %s1974_s20 = smov 0  }
   0xf   :  { %s1976_s21 = smov 0   ;;  %s1978_s22 = smov 0  }
  0x10 LB: > { %2473 = sst [smem:[#allocation19_spill]] %s1868_s17  ;;  %s1999_s23 = sadd.s32 4294967295, %s1888_s22   ;;  %s1888_s22 = sphi %s1978_s22, %s33_s22   ;;  %s1884_s21 = sphi %s1976_s21, %s2508_s21   ;;  %s1880_s20 = sphi %s1974_s20, %s2507_s20   ;;  %s1876_s19 = sphi %s1972_s19, %s2506_s19   ;;  %s1872_s18 = sphi %s1970_s18, %s2505_s18   ;;  %s1868_s17 = sphi %s1968_s17, %s2504_s17  }
  0x11   : > { %2474 = sst [smem:[#allocation20_spill]] %s1880_s20  ;;  %s2455_s24 = sadd.s32 4294967294, %s1888_s22  }
  0x12   : > { %p67_p0 = scmp.ne.s32.totalorder %s1872_s18, %s1868_s17  ;;  %p2459_p1 = scmp.eq.s32.totalorder %s1999_s23, 0 }
  0x13   : > { %p267_p3 = scmp.eq.s32.totalorder %s2455_s24, 1  ;;  %p1418_p5 = scmp.ge.s32.totalorder %s1888_s22, 1 }
  0x14   : > { %p2010_p4 = por %p2459_p1, %p67_p0  ;;  %p330_p7 = scmp.lt.s32.totalorder %s1888_s22, 3 }
  0x15   : > { %p2015_p6 = por %p267_p3, %p67_p0  ;;  %s1890_s28 = smov [#allocation5]  }
  0x16   : > { %s2475_s25 = scalar_select %p2010_p4, 1, 0 }
  0x17   : > { %s2476_s26 = scalar_select %p2015_p6, 1, 0 }
  0x18   : > { %p2020_p8 = pnand %p1418_p5, %p330_p7  ;;  %s348_s29 = sshll.u32 %s1890_s28, 4  ;;  %s2024_s29 = int_to_ptr.vmem [resolvable:$true] %s348_s29 }
  0x19   : > { %2477 = sst [smem:[#allocation21_spill]] %s2476_s26  ;;  %s1891_s12 = smov [#allocation7]  }
  0x1a   : > { %s2478_s27 = scalar_select %p2020_p8, 1, 0 }
  0x1b   : > { %p1520_p9 = pneg %p2020_p8  ;;  %s362_s13 = sshll.u32 %s1891_s12, 4  ;;  %s2035_s13 = int_to_ptr.vmem [resolvable:$true] %s362_s13 }
  0x1c   : > { %s1892_s14 = smov [#allocation8]   ;;  %s1624_s24 = scalar_lea.hbm %s2446_s3, 256 }
  0x1d   : > { %p2031_p11 = pnand %p1520_p9, %p2459_p1  ;;  %s2037_s15 = sshll.u32 %s1892_s14, 4  ;;  %s379_s15 = int_to_ptr.vmem [resolvable:$true] %s2037_s15 }
  0x1e   : > { %p1625_p12 = scmp.ne.s32.totalorder %s2446_s3, %s1624_s24  ;;  %p1631_p5 = scmp.lt.u32.totalorder %s1624_s24, %s2446_s3 }
  0x1f   : > { %p2047_p13 = pneg %p2031_p11 }
  0x21   : > { %p1627_p0 = pnand %p2047_p13, %p1625_p12 }
  0x23   : > { %p1628_p3 = pneg %p1627_p0 }
  0x25   : > { %p1633_p7 = pnand %p1631_p5, %p1628_p3 }
  0x27   : > { %1636 = shalt.err (!%p1633_p7)
}
  0x28   : > { %s1637_s17 = scalar_lea.vmem %s2024_s29, 256  ;;  %p1645_p2 = scmp.lt.s32.totalorder %s2024_s29, %s2024_s29 }
  0x29   : > { %p1638_p9 = scmp.ne.s32.totalorder %s2024_s29, %s1637_s17  ;;  %p1646_p6 = scmp.lt.s32.totalorder %s1637_s17, %s1637_s17 }
  0x2b   : > { %p1640_p10 = pnand %p1638_p9, %p2047_p13  ;;  %p1647_p12 = por %p1646_p6, %p1645_p2 }
  0x2d   : > { %p1641_p1 = pneg %p1640_p10 }
  0x2f   : > { %p1648_p0 = pnand %p1647_p12, %p1641_p1 }
  0x31   : > { %1651 = shalt.err (!%p1648_p0)
}
  0x32   : > { %s1893_s26 = smov 64   ;;  %s1894_s24 = smov 4  }
  0x33   : > { %1523 = dma.hbm_to_vmem [thread:$0]  (!%p2031_p11), %s2446_s3, 256, %s2024_s29, [#allocation6], %s1893_s26, %s1893_s26, %s1894_s24  }
  0x34   : > { %s1652_s17 = scalar_lea.hbm %s2447_s4, 16 }
  0x35   : > { %p1653_p1 = scmp.ne.s32.totalorder %s2447_s4, %s1652_s17  ;;  %p1659_p10 = scmp.lt.u32.totalorder %s1652_s17, %s2447_s4 }
  0x37   : > { %p1655_p2 = pnand %p1653_p1, %p2047_p13 }
  0x39   : > { %p1656_p6 = pneg %p1655_p2 }
  0x3b   : > { %p1661_p3 = pnand %p1659_p10, %p1656_p6 }
  0x3d   : > { %1664 = shalt.err (!%p1661_p3)
}
  0x3e   : > { %s1665_s29 = scalar_lea.vmem %s2035_s13, 16  ;;  %s1672_s9 = scalar_lea.vmem %s2035_s13, 32 }
  0x3f   : > { %p1666_p5 = scmp.ne.s32.totalorder %s2035_s13, %s1665_s29  ;;  %p1673_p12 = scmp.lt.s32.totalorder %s2035_s13, %s2035_s13 }
  0x40   : > { %p1674_p0 = scmp.lt.s32.totalorder %s1672_s9, %s1665_s29 }
  0x41   : > { %p1668_p7 = pnand %p1666_p5, %p2047_p13 }
  0x42   : > { %p1675_p1 = por %p1674_p0, %p1673_p12 }
  0x43   : > { %p1669_p9 = pneg %p1668_p7 }
  0x45   : > { %p1676_p2 = pnand %p1675_p1, %p1669_p9 }
  0x47   : > { %1679 = shalt.err (!%p1676_p2)
}
  0x48   : > { %1526 = dma.hbm_to_vmem [thread:$0]  (!%p2031_p11), %s2447_s4, 16, %s2035_s13, [#allocation6]  }
  0x49   : > { %s1680_s28 = scalar_lea.hbm %s2450_s7, 256 }
  0x4a   : > { %p1681_p6 = scmp.ne.s32.totalorder %s2450_s7, %s1680_s28  ;;  %p1687_p5 = scmp.lt.u32.totalorder %s1680_s28, %s2450_s7 }
  0x4c   : > { %p1683_p10 = pnand %p1681_p6, %p2047_p13 }
  0x4e   : > { %p1684_p3 = pneg %p1683_p10 }
  0x50   : > { %p1689_p7 = pnand %p1687_p5, %p1684_p3 }
  0x52   : > { %1692 = shalt.err (!%p1689_p7)
}
  0x53   : > { %s1693_s9 = scalar_lea.vmem %s379_s15, 256  ;;  %p1701_p1 = scmp.lt.s32.totalorder %s379_s15, %s379_s15 }
  0x54   : > { %p1694_p9 = scmp.ne.s32.totalorder %s379_s15, %s1693_s9  ;;  %p1702_p2 = scmp.lt.s32.totalorder %s1693_s9, %s1693_s9 }
  0x56   : > { %p1696_p12 = pnand %p1694_p9, %p2047_p13  ;;  %p1703_p4 = por %p1702_p2, %p1701_p1 }
  0x58   : > { %p1697_p0 = pneg %p1696_p12 }
  0x5a   : > { %p1704_p8 = pnand %p1703_p4, %p1697_p0 }
  0x5c   : > { %1707 = shalt.err (!%p1704_p8)
}
  0x5d   : > { %1529 = dma.hbm_to_vmem [thread:$0]  (!%p2031_p11), %s2450_s7, 256, %s379_s15, [#allocation9], %s1893_s26, %s1893_s26, %s1894_s24  }
  0x5e   : > { %s54_s11 = sadd.s32 1, %s1876_s19  ;;  %s45_s30 = sadd.s32 1, %s1884_s21 }
  0x5f   : > { %p61_p4 = scmp.ne.s32.totalorder %s1876_s19, %s1872_s18  ;;  %p47_p8 = scmp.ge.s32.totalorder %s45_s30, 2 }
  0x60   : > { %p62_p13 = scmp.eq.s32.totalorder %s1888_s22, 0  ;;  %p2481_p6 = scmp.eq.s32.totalorder %s1999_s23, 1 }
  0x61   : > { %p1547_p3 = scmp.lt.s32.totalorder %s1888_s22, 2  ;;  %s2510_s30 = smov (%p47_p8, %s45_s30), 0 }
  0x62   : > { %p2124_p10 = por %p2481_p6, %p61_p4  ;;  %p63_p5 = por %p62_p13, %p61_p4 }
  0x63   : > { %s395_s20 = sand.u32 1, %s1876_s19   ;;  %s49_s16 = ssub.s32 %s1884_s21, %s2510_s30 }
  0x64   : > { %p52_p7 = scmp.eq.s32.totalorder %s49_s16, 0  ;;  %s1423_s15 = sshll.u32 %s395_s20, 3 }
  0x65   : > { %s1424_s26 = sshll.u32 %s1884_s21, 7  ;;  %s2483_s0 = sld [smem:[#allocation22_spill]] }
  0x66   : > { %s2136_s24 = scalar_select %p52_p7, %s1876_s19, %s54_s11  }
  0x67   : > { %s399_s17 = scalar_lea.vmem [#allocation2], %s1423_s15  ;;  %p2147_p11 = pnand %p1547_p3, %p63_p5 }
  0x68   : > { %s407_s29 = sshll.u32 %s399_s17, 4  ;;  %s396_s13 = scalar_lea.sflag [#allocation3], %s395_s20  ;;  %s2143_s29 = int_to_ptr.vmem [resolvable:$true] %s407_s29 }
  0x69   : > { %p1710_p12 = pneg %p2147_p11 }
  0x6b   : > { %s2141_s14 = scalar_lea.hbm %s2483_s0, %s1424_s26  ;;  %s1713_s15 = scalar_lea.hbm %s2483_s0, 256 }
  0x6c   : > { %s1708_s8 = scalar_lea.hbm %s2141_s14, 128  ;;  %p1714_p2 = scmp.lt.u32.totalorder %s2141_s14, %s2483_s0 }
  0x6d   : > { %p1709_p9 = scmp.ne.s32.totalorder %s2141_s14, %s1708_s8  ;;  %p1715_p4 = scmp.lt.u32.totalorder %s1713_s15, %s1708_s8 }
  0x6e   : > { %p1717_p13 = scmp.lt.u32.totalorder %s1708_s8, %s2141_s14 }
  0x6f   : > { %p1711_p0 = pnand %p1710_p12, %p1709_p9  ;;  %p1716_p8 = por %p1715_p4, %p1714_p2 }
  0x71   : > { %p1712_p1 = pneg %p1711_p0  ;;  %p1718_p6 = por %p1717_p13, %p1716_p8 }
  0x73   : > { %p1719_p3 = pnand %p1718_p6, %p1712_p1 }
  0x75   : > { %1722 = shalt.err (!%p1719_p3)
}
  0x76   : > { %s1723_s20 = scalar_lea.vmem %s2143_s29, 128  ;;  %s1895_s12 = smov [#allocation2]  }
  0x77   : > { %p1724_p5 = scmp.ne.s32.totalorder %s2143_s29, %s1723_s20  ;;  %s1728_s17 = sshll.u32 %s1895_s12, 4  ;;  %s1729_s17 = int_to_ptr.vmem [resolvable:$false] %s1728_s17 }
  0x78   : > { %s1730_s11 = scalar_lea.vmem %s1729_s17, 256  ;;  %p1731_p0 = scmp.lt.s32.totalorder %s2143_s29, %s1729_s17 }
  0x79   : > { %p1726_p7 = pnand %p1724_p5, %p1710_p12  ;;  %p1732_p2 = scmp.lt.s32.totalorder %s1730_s11, %s1723_s20 }
  0x7b   : > { %p1727_p9 = pneg %p1726_p7  ;;  %p1733_p4 = por %p1732_p2, %p1731_p0 }
  0x7d   : > { %p1734_p8 = pnand %p1733_p4, %p1727_p9 }
  0x7f   : > { %1737 = shalt.err (!%p1734_p8)
}
  0x80   : > { %1533 = dma.hbm_to_vmem [thread:$0]  (!%p2147_p11), %s2141_s14, 128, %s2143_s29, %s396_s13  }
  0x81   : > { %p2485_p1 = scmp.ne.s32.totalorder %s2478_s27, 0 }
  0x82   : > { %s2179_s8 = sand.u32 (!%p2485_p1), 1, %s1872_s18   ;;  %p2486_p12 = scmp.ne.s32.totalorder (!%p2485_p1), %s2475_s25, 0 }
  0x83   : > { %416 = sbr.rel (%p2485_p1) target bundleno = 903 (0x387), region = 56  ;;  %s1426_s16 = sshll.u32 (!%p2485_p1), %s2179_s8, 3 }
  0x84   : > { %s419_s15 = scalar_lea.sflag (!%p2485_p1), [#allocation3], %s2179_s8  ;;  %s422_s26 = scalar_lea.vmem (!%p2485_p1), [#allocation2], %s1426_s16 }
  0x8a   : > { %1847 = dma.done.wait (%p2486_p12), %s419_s15, 128  }
  0x8b   : > { %1849 = vsyncadd (%p2486_p12), %s419_s15, 4294967168  ;;  %p2487_p13 = scmp.eq.s32.totalorder %s1999_s23, 0 }
  0x8d   : > { %1851 = dma.done.wait (%p2487_p13), [#allocation6], 272   ;;  %p2488_p11 = pmov %p2487_p13 }
  0x8f   : > { %1853 = vsyncadd (%p2488_p11), [#allocation6], 4294967024  ;;  %p2489_p6 = pmov %p2488_p11 }
  0x91   : > { %1855 = dma.done.wait (%p2489_p6), [#allocation9], 256   ;;  %p2490_p3 = pmov %p2489_p6 }
  0x92   : > { %vm487_vm0 = vcmask 261120   ;;  %v484_v0 = vld [vmem:[%s422_s26] sm:$0xff]  ;;  %v1614_v7 = vld [vmem:[#allocation5] sm:$0xff]   ;;  %v1896_v9 = vmov 0.0   ;;  %v1616_v10 = vld [vmem:[#allocation5 + $0x8] sm:$0xff]   ;;  %vm1897_vm1 = vmmov 0   ;;  %v731_v50 = vlaneseq }
  0x93   : > { %1857 = vsyncadd (%p2490_p3), [#allocation9], 4294967040  ;;  %v488_v1 = vsel %vm487_vm0, %v484_v0, 0.0  ;;  %v1615_v8 = vld [vmem:[%s2448_s5] sm:$0xff]   ;;  %1476 = vmatprep.subr.bf16.mxu0 %v1896_v9  ;;  %1484 = vmatprep.subr.bf16.mxu1 %v1896_v9  ;;  %v1617_v11 = vld [vmem:[%s2448_s5 + $0x8] sm:$0xff]   ;;  %s1898_s11 = smov 104  }
  0x94   : > { %489 = vadd.xlane.f32.xlu0 %v488_v1  ;;  %1477 = vmatpush3.bf16.msra.mxu0 %v1614_v7  ;;  %v1433_v21 = vld [vmem:[%s2444_s1] ss:$0 sm:$0xff]  ;;  %v1618_v26 = vld [vmem:[#allocation8] sm:$0xff]   ;;  %v1619_v28 = vld [vmem:[#allocation8 + $0x8] sm:$0xff]   ;;  %s1899_s16 = smov 120   ;;  %s1900_s15 = smov 112  }
  0x95   : > { %1485 = vmatpush3.bf16.msra.mxu1 %v1615_v8  ;;  %1478 = vmatprep.subr.bf16.mxu0 %v1896_v9  ;;  %v1434_v23 = vld [vmem:[%s2445_s2] ss:$0 sm:$0xff]  ;;  %s2491_s27 = sld [smem:[#allocation23_spill]]  ;;  %v1901_v48 = vmov 1983009808   ;;  %v732_v54 = vshrl.u32 %v731_v50, 7 }
  0x96   : > { %1486 = vmatprep.subr.bf16.mxu1 %v1896_v9  ;;  %1480 = vmatprep.mubr.msk.bf16.mxu0 %vm1897_vm1, %v1896_v9  ;;  %v1439_v29 = vld [vmem:[%s2449_s6] ss:$0 sm:$0xff]  ;;  %v729_v49 = vunpack.c.l.s4 %v1901_v48  ;;  %v1902_v51 = vmov 1934713408   ;;  %s2250_s14 = sshll.u32 %s2179_s8, 4  ;;  %s2492_s29 = sld [smem:[#allocation20_spill]] }
  0x97   : > { %1488 = vmatprep.mubr.msk.bf16.mxu1 %vm1897_vm1, %v1896_v9  ;;  %v1435_v35 = vld [vmem:[#allocation7] ss:$0 sm:$0xff]  ;;  %v761_v52 = vunpack.c.l.s4 %v1902_v51  ;;  %vm866_vm4 = vcmask 60416   ;;  %s1184_s9 = sand.u32 1, %s1999_s23   ;;  %s475_s28 = scalar_lea.vmem [#allocation11], %s2250_s14 }
  0x98   : > { %1479 = vmatpush3.bf16.msra.mxu0 %v1616_v10  ;;  %v730_v53 = vunpack.c.0.s8 %v729_v49  ;;  %s1221_s20 = sshll.u32 %s475_s28, 4  ;;  %s1903_s25 = smov [#allocation11]   ;;  %s2273_s20 = int_to_ptr.vmem [resolvable:$true] %s1221_s20 }
  0x99   : > { %1487 = vmatpush3.bf16.msra.mxu1 %v1617_v11  ;;  %1492 = vmatprep.subr.bf16.mxu0 %v1896_v9  ;;  %v762_v57 = vunpack.c.0.s8 %v761_v52  ;;  %s1738_s26 = scalar_lea.vmem %s2273_s20, 256 }
  0x9a   : > { %v2231_v58 = vsub.s32 %v730_v53, %v732_v54  ;;  %p1739_p5 = scmp.ne.s32.totalorder %s2273_s20, %s1738_s26 }
  0x9b   : > { %v1443_v46 = vld [vmem:[%s2491_s27] ss:$0 sm:$0xff]  ;;  %s1742_s27 = sshll.u32 %s1903_s25, 4  ;;  %s1743_s27 = int_to_ptr.vmem [resolvable:$false] %s1742_s27 }
  0x9c   : > { %s2264_s13 = sshll.u32 %s2492_s29, 8  ;;  %p1740_p7 = pnand %p1739_p5, %p2124_p10 }
  0x9d   : > { %s1744_s29 = scalar_lea.vmem %s1743_s27, 512  ;;  %p1745_p0 = scmp.lt.s32.totalorder %s2273_s20, %s1743_s27 }
  0x9e   : > { %p1741_p9 = pneg %p1740_p7  ;;  %p1746_p2 = scmp.lt.s32.totalorder %s1744_s29, %s1738_s26 }
  0xa0   : > { %p1747_p4 = por %p1746_p2, %p1745_p0 }
  0xa2   : > { %p1748_p8 = pnand %p1747_p4, %p1741_p9 }
 0x121   : > { %v490_v2 = vpop.xlane.xlu0 %489 }
 0x122   : > { %v491_v3 = vmul.f32 0.03125, %v490_v2 }
 0x124   : > { %v492_v4 = vsub.f32 %v484_v0, %v491_v3  ;;  %v2233_v0 = vsub.s32 %v762_v57, %v732_v54 }
 0x126   : > { %v493_v5 = vmul.f32 %v492_v4, %v492_v4 }
 0x128   : > { %v494_v6 = vsel %vm487_vm0, %v493_v5, 0.0 }
 0x129   : > { %495 = vadd.xlane.f32.xlu0 %v494_v6 }
 0x1b6   : > { %v496_v12 = vpop.xlane.xlu0 %495 }
 0x1b7   : > { %v497_v13 = vmul.f32 0.032258064, %v496_v12 }
 0x1b9   : > { %1620 = vrsqrt.f32 %v497_v13  ;;  %vm500_vm2 = vcmp.eq.f32.partialorder %v497_v13, inf  ;;  %v503_v16 = vand.u32 2147483648, %v497_v13  ;;  %vm502_vm3 = vcmp.eq.f32.partialorder %v497_v13, 0.0 }
 0x1c3   : > { %v1621_v14 = vpop.eup %1620 }
 0x1c4   : > { %v499_v15 = vmul.f32 %v1621_v14, %v497_v13 }
 0x1c6   : > { %v501_v17 = vsel %vm500_vm2, %v497_v13, %v499_v15 }
 0x1c7   : > { %v504_v18 = vsel %vm502_vm3, %v503_v16, %v501_v17 }
 0x1c8   : > { %v505_v19 = vadd.f32 1e-06, %v504_v18 }
 0x1ca   : > { %1622 = vrcp.f32 %v505_v19 }
 0x1d4   : > { %v1623_v20 = vpop.eup %1622 }
 0x1d5   : > { %v507_v22 = vmul.f32 %v1623_v20, %v492_v4 }
 0x1d7   : > { %v514_v24 = vmul.f32 %v1433_v21, %v507_v22 }
 0x1d9   : > { %v521_v25 = vadd.f32 %v1434_v23, %v514_v24 }
 0x1db   : > { %v522_v27 = vpack.c.bf16 %v521_v25, %v521_v25 }
 0x1dd   : > { %1481 = vmatmul.mubr.msk.bf16.vlgmr.msra.gmra.mrb[0].mxu0 %vm487_vm0, %v522_v27  ;;  %1489 = vmatmul.mubr.msk.bf16.vlgmr.msra.gmra.mrb[0].mxu1 %vm487_vm0, %v522_v27 }
 0x1de   : > { %1493 = vmatpush3.bf16.msra.mxu0 %v1618_v26  ;;  %1496 = vmatprep.mubr.msk.bf16.mxu0 %vm1897_vm1, %v1896_v9 }
 0x1df   : > { %1494 = vmatprep.subr.bf16.mxu0 %v1896_v9 }
 0x1e2   : > { %1495 = vmatpush3.bf16.msra.mxu0 %v1619_v28 }
 0x1e5   : > { %1497 = vmatmul.mubr.msk.bf16.vlgmr.msra.gmra.mrb[4].mxu0 %vm487_vm0, %v522_v27 }
 0x2b0   : > { %v583_v30 = vpop.f32.mrb[0].mxu0  ;;  %v646_v31 = vpop.f32.mrb[0].mxu1 }
 0x2b1   : > { %v647_v32 = vadd.f32 %v1439_v29, %v646_v31  ;;  %v1482_v33 = vpop.f32.mrb[1].mxu0  ;;  %v1490_v34 = vpop.f32.mrb[1].mxu1  ;;  %v584_v40 = vadd.f32 %v1435_v35, %v583_v30 }
 0x2b2   : > { %v586_v36 = vpop.f32.mrb[2].mxu0  ;;  %v649_v37 = vpop.f32.mrb[2].mxu1 }
 0x2b3   : > { %878 = vrot.lane.b32.xlu0 %v647_v32, %s1898_s11  ;;  %872 = vrot.lane.b32.xlu1 %v647_v32, %s1899_s16  ;;  %v1483_v38 = vpop.f32.mrb[3].mxu0  ;;  %v1491_v39 = vpop.f32.mrb[3].mxu1  ;;  %v2218_v42 = vmul.f32 0.35355338, %v584_v40 }
 0x2b7   : > { %875 = vrot.lane.b32.xlu1 %v647_v32, %s1900_s15 }
 0x2b8   : > { %v709_v41 = vpop.f32.mrb[4].mxu0 }
 0x2b9   : > { %v1498_v43 = vpop.f32.mrb[5].mxu0  ;;  %v2226_v47 = vadd.f32 %v1443_v46, %v709_v41 }
 0x2ba   : > { %v712_v44 = vpop.f32.mrb[6].mxu0 }
 0x2bb   : > { %717 = vrot.lane.b32.xlu1 %v2218_v42, %s1899_s16  ;;  %v1499_v45 = vpop.f32.mrb[7].mxu0 }
 0x2bf   : > { %720 = vrot.lane.b32.xlu1 %v2218_v42, %s1900_s15 }
 0x2c3   : > { %723 = vrot.lane.b32.xlu1 %v2218_v42, %s1898_s11 }
 0x2c7   : > { %1026 = vrot.lane.b32.xlu1 %v2226_v47, %s1899_s16 }
 0x2cb   : > { %1029 = vrot.lane.b32.xlu1 %v2226_v47, %s1900_s15  ;;  %s2285_s15 = scalar_lea.sflag [#allocation12], %s1184_s9 }
 0x2cf   : > { %1032 = vrot.lane.b32.xlu1 %v2226_v47, %s1898_s11  ;;  %s2493_s11 = sld [smem:[#allocation25_spill]] }
 0x2d5   : > { %s2271_s16 = scalar_lea.hbm %s2493_s11, %s2264_s13 }
 0x325   : > { %v879_v55 = vpop.permute.xlu0 %878  ;;  %v873_v56 = vpop.permute.xlu1 %872 }
 0x326   : > { %v897_v59 = vcombine.low %v873_v56, %v879_v55  ;;  %v898_v60 = vcombine.high %v873_v56, %v879_v55 }
 0x328   : > { %v905_v1 = vrot.slane %v897_v59, %v2231_v58  ;;  %v912_v2 = vrot.slane %v898_v60, %v2231_v58 }
 0x329   : > { %v876_v61 = vpop.permute.xlu1 %875 }
 0x32a   : > { %v881_v62 = vcombine.low %v647_v32, %v876_v61  ;;  %v882_v63 = vcombine.high %v647_v32, %v876_v61 }
 0x32c   : > { %v889_v3 = vrot.slane %v881_v62, %v2231_v58  ;;  %v896_v4 = vrot.slane %v882_v63, %v2231_v58 }
 0x32d   : > { %v718_v5 = vpop.permute.xlu1 %717 }
 0x32e   : > { %v913_v6 = vcombine.low %v889_v3, %v905_v1  ;;  %v914_v7 = vcombine.high %v889_v3, %v905_v1  ;;  %v929_v8 = vcombine.low %v896_v4, %v912_v2  ;;  %v930_v9 = vcombine.high %v896_v4, %v912_v2 }
 0x330   : > { %v921_v10 = vrot.slane %v913_v6, %v2233_v0  ;;  %v928_v11 = vrot.slane %v914_v7, %v2233_v0  ;;  %v937_v12 = vrot.slane %v929_v8, %v2233_v0  ;;  %v944_v13 = vrot.slane %v930_v9, %v2233_v0 }
 0x331   : > { %v721_v14 = vpop.permute.xlu1 %720 }
 0x332   : > { %v949_v15 = vcombine.low %v921_v10, %v928_v11  ;;  %v1449_v16 = vcombine.high %v921_v10, %v928_v11  ;;  %v965_v17 = vcombine.low %v937_v12, %v944_v13  ;;  %v1450_v18 = vcombine.high %v937_v12, %v944_v13 }
 0x333   : > { %v726_v23 = vcombine.low %v2218_v42, %v721_v14  ;;  %v727_v24 = vcombine.high %v2218_v42, %v721_v14 }
 0x334   : > { %v956_v19 = vrot.slane %v949_v15, %v2231_v58  ;;  %v964_v20 = vrot.slane %v1449_v16, %v2231_v58  ;;  %v972_v21 = vrot.slane %v965_v17, %v2231_v58  ;;  %v980_v22 = vrot.slane %v1450_v18, %v2231_v58 }
 0x335   : > { %v724_v25 = vpop.permute.xlu1 %723  ;;  %v734_v36 = vrot.slane %v726_v23, %v2231_v58  ;;  %v741_v37 = vrot.slane %v727_v24, %v2231_v58 }
 0x336   : > { %v981_v26 = vcombine.low %v956_v19, %v964_v20  ;;  %v982_v27 = vcombine.high %v956_v19, %v964_v20  ;;  %v997_v28 = vcombine.low %v972_v21, %v980_v22  ;;  %v998_v29 = vcombine.high %v972_v21, %v980_v22 }
 0x337   : > { %v742_v30 = vcombine.low %v718_v5, %v724_v25  ;;  %v743_v31 = vcombine.high %v718_v5, %v724_v25 }
 0x338   : > { %v989_v32 = vrot.slane %v981_v26, %v2233_v0  ;;  %v996_v33 = vrot.slane %v982_v27, %v2233_v0  ;;  %v1005_v34 = vrot.slane %v997_v28, %v2233_v0  ;;  %v1012_v35 = vrot.slane %v998_v29, %v2233_v0 }
 0x339   : > { %v750_v38 = vrot.slane %v742_v30, %v2231_v58  ;;  %v757_v39 = vrot.slane %v743_v31, %v2231_v58  ;;  %v2261_v40 = vpop.permute.xlu1 %1026 }
 0x33a   : > { %v1013_v41 = vcombine.low %v989_v32, %v1005_v34  ;;  %v1014_v42 = vcombine.high %v989_v32, %v1005_v34  ;;  %v1015_v43 = vcombine.low %v996_v33, %v1012_v35  ;;  %v1016_v44 = vcombine.high %v996_v33, %v1012_v35 }
 0x33b   : > { %v758_v45 = vcombine.low %v734_v36, %v750_v38  ;;  %v759_v46 = vcombine.high %v734_v36, %v750_v38  ;;  %v774_v48 = vcombine.low %v741_v37, %v757_v39  ;;  %v775_v49 = vcombine.high %v741_v37, %v757_v39 }
 0x33c   : > { %v1017_v50 = vpack.c.bf16 %v1013_v41, %v1013_v41  ;;  %v1018_v51 = vpack.c.bf16 %v1014_v42, %v1014_v42  ;;  %v1019_v52 = vpack.c.bf16 %v1015_v43, %v1015_v43  ;;  %v1020_v53 = vpack.c.bf16 %v1016_v44, %v1016_v44 }
 0x33d   : > { %v766_v54 = vrot.slane %v758_v45, %v2233_v0  ;;  %v773_v55 = vrot.slane %v759_v46, %v2233_v0  ;;  %v782_v56 = vrot.slane %v774_v48, %v2233_v0  ;;  %v789_v57 = vrot.slane %v775_v49, %v2233_v0  ;;  %v1030_v59 = vpop.permute.xlu1 %1029 }
 0x33e   : > { %1021 = vst.msk [vmem:[%s475_s28] sm:$0xf] %vm866_vm4, %v1017_v50  ;;  %1022 = vst.msk [vmem:[%s475_s28 + $0x4] sm:$0xf] %vm866_vm4, %v1018_v51 }
 0x33f   : > { %1023 = vst.msk [vmem:[%s475_s28 + $0x8] sm:$0xf] %vm866_vm4, %v1019_v52  ;;  %1024 = vst.msk [vmem:[%s475_s28 + $0xc] sm:$0xf] %vm866_vm4, %v1020_v53  ;;  %v794_v60 = vcombine.low %v766_v54, %v773_v55  ;;  %v1447_v61 = vcombine.high %v766_v54, %v773_v55  ;;  %v810_v62 = vcombine.low %v782_v56, %v789_v57 }
 0x340   : > { %v1448_v63 = vcombine.high %v782_v56, %v789_v57 }
 0x341   : > { %1751 = shalt.err (!%p1748_p8)
}
 0x342   : > { %s1752_s23 = scalar_lea.hbm %s2271_s16, 256  ;;  %s1756_s12 = scalar_lea.hbm %s2493_s11, 512 }
 0x343   : > { %p1753_p1 = scmp.ne.s32.totalorder %s2271_s16, %s1752_s23  ;;  %p1757_p11 = scmp.lt.u32.totalorder %s2271_s16, %s2493_s11 }
 0x344   : > { %p1758_p6 = scmp.lt.u32.totalorder %s1756_s12, %s1752_s23  ;;  %p1760_p5 = scmp.lt.u32.totalorder %s1752_s23, %s2271_s16 }
 0x345   : > { %p1754_p12 = pnand %p1753_p1, %p2124_p10 }
 0x346   : > { %p1759_p3 = por %p1758_p6, %p1757_p11 }
 0x347   : > { %p1755_p13 = pneg %p1754_p12 }
 0x348   : > { %p1761_p7 = por %p1760_p5, %p1759_p3 }
 0x34a   : > { %p1762_p9 = pnand %p1761_p7, %p1755_p13 }
 0x34c   : > { %1765 = shalt.err (!%p1762_p9)
}
 0x34d   : > { %s2464_s26 = smov 64   ;;  %s2466_s27 = smov 4   ;;  %v1035_v1 = vcombine.low %v2226_v47, %v1030_v59  ;;  %v1036_v2 = vcombine.high %v2226_v47, %v1030_v59  ;;  %v801_v3 = vrot.slane %v794_v60, %v2231_v58  ;;  %v809_v4 = vrot.slane %v1447_v61, %v2231_v58  ;;  %v1033_v7 = vpop.permute.xlu1 %1032 }
 0x34e   : > { %1515 = dma.vmem_to_hbm [thread:$0]  (%p2124_p10), %s2273_s20, 256, %s2271_s16, %s2285_s15, %s2464_s26, %s2464_s26, %s2466_s27   ;;  %v817_v5 = vrot.slane %v810_v62, %v2231_v58  ;;  %v825_v6 = vrot.slane %v1448_v63, %v2231_v58  ;;  %v1051_v8 = vcombine.low %v2261_v40, %v1033_v7  ;;  %v1052_v9 = vcombine.high %v2261_v40, %v1033_v7 }
 0x34f   : > { %v826_v10 = vcombine.low %v801_v3, %v809_v4  ;;  %v827_v11 = vcombine.high %v801_v3, %v809_v4  ;;  %v1043_v47 = vrot.slane %v1035_v1, %v2231_v58  ;;  %v1050_v14 = vrot.slane %v1036_v2, %v2231_v58  ;;  %s468_s20 = scalar_lea.vmem [#allocation10], %s2250_s14  ;;  %s2494_s9 = sld [smem:[#allocation24_spill]] }
 0x350   : > { %v842_v12 = vcombine.low %v817_v5, %v825_v6  ;;  %v843_v13 = vcombine.high %v817_v5, %v825_v6  ;;  %v1059_v15 = vrot.slane %v1051_v8, %v2231_v58  ;;  %v1066_v16 = vrot.slane %v1052_v9, %v2231_v58  ;;  %s1204_s16 = sshll.u32 %s468_s20, 4  ;;  %s1906_s25 = smov [#allocation10]   ;;  %s2339_s16 = int_to_ptr.vmem [resolvable:$true] %s1204_s16 }
 0x351   : > { %v834_v17 = vrot.slane %v826_v10, %v2233_v0  ;;  %v841_v18 = vrot.slane %v827_v11, %v2233_v0  ;;  %s1766_s17 = scalar_lea.vmem %s2339_s16, 256  ;;  %s1770_s29 = sshll.u32 %s1906_s25, 4  ;;  %s1771_s29 = int_to_ptr.vmem [resolvable:$false] %s1770_s29 }
 0x352   : > { %v850_v19 = vrot.slane %v842_v12, %v2233_v0  ;;  %v857_v20 = vrot.slane %v843_v13, %v2233_v0  ;;  %v1067_v21 = vcombine.low %v1043_v47, %v1059_v15  ;;  %v1068_v22 = vcombine.high %v1043_v47, %v1059_v15  ;;  %p1767_p0 = scmp.ne.s32.totalorder %s2339_s16, %s1766_s17  ;;  %s1772_s23 = scalar_lea.vmem %s1771_s29, 512 }
 0x353   : > { %v1083_v23 = vcombine.low %v1050_v14, %v1066_v16  ;;  %v1084_v24 = vcombine.high %v1050_v14, %v1066_v16  ;;  %p1773_p8 = scmp.lt.s32.totalorder %s2339_s16, %s1771_s29  ;;  %p1774_p1 = scmp.lt.s32.totalorder %s1772_s23, %s1766_s17 }
 0x354   : > { %v858_v25 = vcombine.low %v834_v17, %v850_v19  ;;  %v859_v26 = vcombine.high %v834_v17, %v850_v19  ;;  %v860_v27 = vcombine.low %v841_v18, %v857_v20  ;;  %v861_v28 = vcombine.high %v841_v18, %v857_v20  ;;  %p1768_p2 = pnand %p1767_p0, %p2124_p10 }
 0x355   : > { %v1075_v29 = vrot.slane %v1067_v21, %v2233_v0  ;;  %v1082_v30 = vrot.slane %v1068_v22, %v2233_v0  ;;  %v1091_v31 = vrot.slane %v1083_v23, %v2233_v0  ;;  %v1098_v32 = vrot.slane %v1084_v24, %v2233_v0  ;;  %s2337_s28 = scalar_lea.hbm %s2494_s9, %s2264_s13  ;;  %p1775_p12 = por %p1774_p1, %p1773_p8 }
 0x356   : > { %v862_v33 = vpack.c.bf16 %v858_v25, %v858_v25  ;;  %v863_v34 = vpack.c.bf16 %v859_v26, %v859_v26  ;;  %v864_v35 = vpack.c.bf16 %v860_v27, %v860_v27  ;;  %v865_v36 = vpack.c.bf16 %v861_v28, %v861_v28  ;;  %p1769_p4 = pneg %p1768_p2 }
 0x357   : > { %v1103_v37 = vcombine.low %v1075_v29, %v1082_v30  ;;  %v1451_v38 = vcombine.high %v1075_v29, %v1082_v30  ;;  %v1119_v39 = vcombine.low %v1091_v31, %v1098_v32  ;;  %v1452_v40 = vcombine.high %v1091_v31, %v1098_v32 }
 0x358   : > { %867 = vst.msk [vmem:[%s468_s20] sm:$0xf] %vm866_vm4, %v862_v33  ;;  %868 = vst.msk [vmem:[%s468_s20 + $0x4] sm:$0xf] %vm866_vm4, %v863_v34  ;;  %p1776_p13 = pnand %p1775_p12, %p1769_p4 }
 0x359   : > { %869 = vst.msk [vmem:[%s468_s20 + $0x8] sm:$0xf] %vm866_vm4, %v864_v35  ;;  %870 = vst.msk [vmem:[%s468_s20 + $0xc] sm:$0xf] %vm866_vm4, %v865_v36  ;;  %v1110_v41 = vrot.slane %v1103_v37, %v2231_v58  ;;  %v1118_v42 = vrot.slane %v1451_v38, %v2231_v58  ;;  %v1126_v43 = vrot.slane %v1119_v39, %v2231_v58 }
 0x35a   : > { %v1134_v44 = vrot.slane %v1452_v40, %v2231_v58 }
 0x35b   : > { %1779 = shalt.err (!%p1776_p13)
}
 0x35c   : > { %s1780_s20 = scalar_lea.hbm %s2337_s28, 256  ;;  %s1784_s25 = scalar_lea.hbm %s2494_s9, 512 }
 0x35d   : > { %p1781_p11 = scmp.ne.s32.totalorder %s2337_s28, %s1780_s20  ;;  %p1785_p5 = scmp.lt.u32.totalorder %s2337_s28, %s2494_s9 }
 0x35e   : > { %p1786_p7 = scmp.lt.u32.totalorder %s1784_s25, %s1780_s20  ;;  %p1788_p0 = scmp.lt.u32.totalorder %s1780_s20, %s2337_s28 }
 0x35f   : > { %p1782_p6 = pnand %p1781_p11, %p2124_p10 }
 0x360   : > { %p1787_p9 = por %p1786_p7, %p1785_p5 }
 0x361   : > { %p1783_p3 = pneg %p1782_p6 }
 0x362   : > { %p1789_p2 = por %p1788_p0, %p1787_p9 }
 0x364   : > { %p1790_p4 = pnand %p1789_p2, %p1783_p3 }
 0x366   : > { %1793 = shalt.err (!%p1790_p4)
}
 0x367   : > { %s2495_s17 = smov 4   ;;  %s2496_s23 = smov 64   ;;  %v1135_v58 = vcombine.low %v1110_v41, %v1118_v42  ;;  %v1136_v45 = vcombine.high %v1110_v41, %v1118_v42  ;;  %v1151_v46 = vcombine.low %v1126_v43, %v1134_v44  ;;  %v1152_v48 = vcombine.high %v1126_v43, %v1134_v44 }
 0x368   : > { %s2497_s0 = scalar_lea.sflag [#allocation4], %s2179_s8  ;;  %s482_s26 = scalar_lea.vmem [#allocation13], %s2250_s14 }
 0x369   : > { %1514 = dma.vmem_to_hbm [thread:$0]  (%p2124_p10), %s2339_s16, 256, %s2337_s28, %s2497_s0, %s2496_s23, %s2496_s23, %s2495_s17   ;;  %v1143_v49 = vrot.slane %v1135_v58, %v2233_v0  ;;  %v1150_v50 = vrot.slane %v1136_v45, %v2233_v0  ;;  %v1159_v51 = vrot.slane %v1151_v46, %v2233_v0  ;;  %v1166_v52 = vrot.slane %v1152_v48, %v2233_v0 }
 0x36a   : > { %s1238_s27 = sshll.u32 %s482_s26, 4  ;;  %s2498_s16 = sld [smem:[#allocation26_spill]]  ;;  %s2387_s27 = int_to_ptr.vmem [resolvable:$true] %s1238_s27 }
 0x36b   : > { %v1167_v53 = vcombine.low %v1143_v49, %v1159_v51  ;;  %v1168_v54 = vcombine.high %v1143_v49, %v1159_v51  ;;  %v1169_v55 = vcombine.low %v1150_v50, %v1166_v52  ;;  %v1170_v56 = vcombine.high %v1150_v50, %v1166_v52  ;;  %s1794_s14 = scalar_lea.vmem %s2387_s27, 256 }
 0x36c   : > { %p1795_p8 = scmp.ne.s32.totalorder %s2387_s27, %s1794_s14 }
 0x36d   : > { %v1171_v57 = vpack.c.bf16 %v1167_v53, %v1167_v53  ;;  %v1172_v59 = vpack.c.bf16 %v1168_v54, %v1168_v54  ;;  %v1173_v60 = vpack.c.bf16 %v1169_v55, %v1169_v55  ;;  %v1174_v61 = vpack.c.bf16 %v1170_v56, %v1170_v56 }
 0x36e   : > { %p1796_p1 = pnand %p1795_p8, %p2124_p10 }
 0x36f   : > { %1175 = vst.msk [vmem:[%s482_s26] sm:$0xf] %vm866_vm4, %v1171_v57  ;;  %1176 = vst.msk [vmem:[%s482_s26 + $0x4] sm:$0xf] %vm866_vm4, %v1172_v59 }
 0x370   : > { %s2385_s28 = scalar_lea.hbm %s2498_s16, %s2264_s13  ;;  %1177 = vst.msk [vmem:[%s482_s26 + $0x8] sm:$0xf] %vm866_vm4, %v1173_v60  ;;  %1178 = vst.msk [vmem:[%s482_s26 + $0xc] sm:$0xf] %vm866_vm4, %v1174_v61  ;;  %p1797_p12 = pneg %p1796_p1 }
 0x371   : > { %s1907_s13 = smov [#allocation13]  }
 0x372   : > { %s1798_s12 = sshll.u32 %s1907_s13, 4  ;;  %s1799_s12 = int_to_ptr.vmem [resolvable:$false] %s1798_s12 }
 0x373   : > { %s1800_s20 = scalar_lea.vmem %s1799_s12, 512  ;;  %p1801_p13 = scmp.lt.s32.totalorder %s2387_s27, %s1799_s12 }
 0x374   : > { %p1802_p11 = scmp.lt.s32.totalorder %s1800_s20, %s1794_s14 }
 0x376   : > { %p1803_p6 = por %p1802_p11, %p1801_p13 }
 0x378   : > { %p1804_p3 = pnand %p1803_p6, %p1797_p12 }
 0x37a   : > { %1807 = shalt.err (!%p1804_p3)
}
 0x37b   : > { %s1808_s25 = scalar_lea.hbm %s2385_s28, 256  ;;  %s1812_s0 = scalar_lea.hbm %s2498_s16, 512 }
 0x37c   : > { %p1809_p5 = scmp.ne.s32.totalorder %s2385_s28, %s1808_s25  ;;  %p1813_p0 = scmp.lt.u32.totalorder %s2385_s28, %s2498_s16 }
 0x37d   : > { %p1814_p2 = scmp.lt.u32.totalorder %s1812_s0, %s1808_s25  ;;  %p1816_p8 = scmp.lt.u32.totalorder %s1808_s25, %s2385_s28 }
 0x37e   : > { %p1810_p7 = pnand %p1809_p5, %p2124_p10 }
 0x37f   : > { %p1815_p4 = por %p1814_p2, %p1813_p0 }
 0x380   : > { %p1811_p9 = pneg %p1810_p7 }
 0x381   : > { %p1817_p1 = por %p1816_p8, %p1815_p4 }
 0x383   : > { %p1818_p12 = pnand %p1817_p1, %p1811_p9 }
 0x385   : > { %1821 = shalt.err (!%p1818_p12)
}
 0x386   : > { %1516 = dma.vmem_to_hbm [thread:$0]  (%p2124_p10), %s2387_s27, 256, %s2385_s28, %s2285_s15, %s2496_s23, %s2496_s23, %s2495_s17  }
 0x387 PF: > { %s2499_s14 = sld [smem:[#allocation19_spill]]  ;;  %s2500_s12 = sld [smem:[#allocation21_spill]] }
 0x388   : > { %p2502_p11 = scmp.ge.s32.totalorder %s1888_s22, 2 }
 0x38d   : > { %s1253_s20 = sand.u32 1, %s2499_s14   ;;  %p2501_p13 = scmp.ne.s32.totalorder %s2500_s12, 0 }
 0x38e   : > { %s1254_s25 = scalar_lea.sflag [#allocation4], %s1253_s20 }
 0x38f   : > { %p1535_p6 = pnand %p2502_p11, %p2501_p13 }
 0x391   : > { %1859 = dma.done.wait (!%p1535_p6), %s1254_s25, 256  }
 0x392   : > { %1861 = vsyncadd (!%p1535_p6), %s1254_s25, 4294967040  ;;  %s2503_s10 = sadd.s32 4294967294, %s1888_s22  }
 0x393   : > { %s1262_s29 = sand.u32 1, %s2503_s10  }
 0x394   : > { %s1263_s26 = scalar_lea.sflag [#allocation12], %s1262_s29 }
 0x395   : > { %1863 = dma.done.wait (!%p1535_p6), %s1263_s26, 512  }
 0x396   : > { %1865 = vsyncadd (!%p1535_p6), %s1263_s26, 4294966784  ;;  %s33_s22 = sadd.s32 1, %s1888_s22   ;;  %s2504_s17 = smov %s1872_s18 }
 0x397   : > { %p30_p10 = scmp.ge.s32.totalorder %s33_s22, 4   ;;  %s2505_s18 = smov %s1876_s19 }
 0x398   : > { %s2506_s19 = smov %s2136_s24  ;;  %s2507_s20 = smov %s1884_s21 }
 0x399   : > { %s2508_s21 = smov %s2510_s30  ;;  %32 = sbr.rel (!%p30_p10) target bundleno = 16 (0x10), region = 145 }
 0x3a0   :  { %1277 = vsyncpa [#allocation3], 1 }
 0x3a1   :  { %1279 = vsyncpa [#allocation3 + $0x1], 1 }
 0x3a2   :  { %1280 = vsyncpa [#allocation6], 1 }
 0x3a3   :  { %1281 = vsyncpa [#allocation9], 1 }
 0x3a4   :  { %1282 = vsyncpa [#allocation4], 1 }
 0x3a5   :  { %1284 = vsyncpa [#allocation4 + $0x1], 1 }
 0x3a6   :  { %1285 = vsyncpa [#allocation12], 1 }
 0x3a7   :  { %1287 = vsyncpa [#allocation12 + $0x1], 1 }

</bundles_post_ra>
